<compile_context>
chip_gen: v7x
topology: tpu7x:2x2x1
jax: 0.10.0
libtpu: 0.0.40
codegen_flags: <defaults>
</compile_context>

<pallas_src>
import jax
import jax.numpy as jnp
import numpy as np
from jax.experimental import pallas as pl
from jax.experimental.pallas import tpu as pltpu


def _round_up(x, m):
    return ((x + m - 1) // m) * m


def _sublane_quantum(dtype):
    itemsize = jnp.dtype(dtype).itemsize
    if itemsize >= 4:
        return 8
    if itemsize == 2:
        return 16
    return 32


def gnn_mlp_kernel(h_ref, w1_ref, b1_ref, w2_ref, b2_ref, w3_ref, b3_ref, o_ref):
    """One row tile of the fused 3-layer MLP. Weights/biases are resident
    (constant index_map), biases are pre-folded with eval-mode BatchNorm."""
    wdt = w1_ref.dtype

    # Layer 1: Linear (BN folded) -> ReLU.  Dropout is identity in eval mode.
    z = jnp.dot(h_ref[...], w1_ref[...],
                preferred_element_type=jnp.float32) + b1_ref[...]
    a = jnp.maximum(z, 0.0)

    # Layer 2: Linear (BN folded) -> ReLU.
    z = jnp.dot(a.astype(wdt), w2_ref[...],
                preferred_element_type=jnp.float32) + b2_ref[...]
    a = jnp.maximum(z, 0.0)

    # Output layer: Linear -> ReLU.  Stored directly at its true 32-lane width.
    z = jnp.dot(a.astype(wdt), w3_ref[...],
                preferred_element_type=jnp.float32) + b3_ref[...]
    o_ref[...] = jnp.maximum(z, 0.0).astype(o_ref.dtype)


def init_params(key, input_dim, hidden_dim=(64, 64), out_dim=32, eps=1e-5):
    """PyTorch-style init. Linear: U(-1/sqrt(fan_in), 1/sqrt(fan_in)); weights
    stored transposed (in, out).  BatchNorm1d defaults -> per-feature scale/shift."""
    dims = [input_dim] + list(hidden_dim) + [out_dim]
    params = {}
    for idx, (din, dout) in enumerate(zip(dims[:-1], dims[1:]), start=1):
        key, kw, kb = jax.random.split(key, 3)
        bound = 1.0 / np.sqrt(din)
        params[f"w{idx}"] = jax.random.uniform(kw, (din, dout), jnp.float32, -bound, bound)
        params[f"b{idx}"] = jax.random.uniform(kb, (1, dout), jnp.float32, -bound, bound)
    for idx, d in enumerate(hidden_dim, start=1):
        gamma = jnp.ones((1, d), jnp.float32)
        beta = jnp.zeros((1, d), jnp.float32)
        running_mean = jnp.zeros((1, d), jnp.float32)
        running_var = jnp.ones((1, d), jnp.float32)
        scale = gamma / jnp.sqrt(running_var + eps)
        shift = beta - running_mean * scale
        params[f"s{idx}"] = scale
        params[f"t{idx}"] = shift
    return params


def prepare_params(params, io_dtype=jnp.bfloat16):
    """Fold eval-mode BatchNorm into the Linear weights/biases once in the
    wrapper (w' = w*s, b' = b*s + t).  No output-lane padding."""
    w1 = params["w1"] * params["s1"]
    b1 = params["b1"] * params["s1"] + params["t1"]
    w2 = params["w2"] * params["s2"]
    b2 = params["b2"] * params["s2"] + params["t2"]
    w3, b3 = params["w3"], params["b3"]
    return {
        "w1": w1.astype(io_dtype), "b1": b1.astype(jnp.float32),
        "w2": w2.astype(io_dtype), "b2": b2.astype(jnp.float32),
        "w3": w3.astype(io_dtype), "b3": b3.astype(jnp.float32),
    }


def gnn_mlp_forward(h, folded, tm=1024, min_row_tiles=8):
    """Tiled over batch rows (ragged last tile handled by Pallas masking);
    folded weights/biases are resident for every tile."""
    N, Din = h.shape
    Dout = folded["w3"].shape[1]

    sublane = _sublane_quantum(h.dtype)
    # Cap the row tile so the "parallel" grid has >= min_row_tiles steps
    # (keeps both v7x TensorCores fed); never below one sublane quantum.
    tm_cap = _round_up(pl.cdiv(N, min_row_tiles), sublane)
    tm_eff = max(sublane, min(_round_up(tm, sublane), tm_cap))
    grid = (pl.cdiv(N, tm_eff),)

    rows = lambda i: (i, 0)      # batch-row tiles
    const = lambda i: (0, 0)     # resident weight / bias blocks

    out = pl.pallas_call(
        gnn_mlp_kernel,
        out_shape=jax.ShapeDtypeStruct((N, Dout), h.dtype),
        grid=grid,
        in_specs=[
            pl.BlockSpec((tm_eff, Din), rows),
            pl.BlockSpec(folded["w1"].shape, const),
            pl.BlockSpec(folded["b1"].shape, const),
            pl.BlockSpec(folded["w2"].shape, const),
            pl.BlockSpec(folded["b2"].shape, const),
            pl.BlockSpec(folded["w3"].shape, const),
            pl.BlockSpec(folded["b3"].shape, const),
        ],
        out_specs=pl.BlockSpec((tm_eff, Dout), rows),
        compiler_params=pltpu.CompilerParams(
            dimension_semantics=("parallel",)),
    )(h, folded["w1"], folded["b1"], folded["w2"], folded["b2"],
      folded["w3"], folded["b3"])

    return out


def gnn_mlp_reference(h, params):
    a = h
    for idx in (1, 2):
        z = a @ params[f"w{idx}"] + params[f"b{idx}"]
        z = z * params[f"s{idx}"] + params[f"t{idx}"]
        a = jnp.maximum(z, 0.0)
    z = a @ params["w3"] + params["b3"]
    return jnp.maximum(z, 0.0)


if __name__ == "__main__":
    key = jax.random.PRNGKey(0)
    k_params, k_h = jax.random.split(key)

    N, input_dim = 64, 16            # small synthetic batch of node features
    params = init_params(k_params, input_dim, hidden_dim=(64, 64), out_dim=32)
    h = jax.random.normal(k_h, (N, input_dim), jnp.float32)
    ref = gnn_mlp_reference(h, params)

    # f32 path (tile capped so the small batch still yields multiple grid steps).
    folded_f32 = prepare_params(params, io_dtype=jnp.float32)
    out = jax.block_until_ready(gnn_mlp_forward(h, folded_f32, tm=1024))
    assert out.shape == (N, 32)
    np.testing.assert_allclose(np.asarray(out), np.asarray(ref), rtol=1e-4, atol=1e-4)

    # Non-divisible batch (ragged last row block, no wrapper-side padding).
    N2 = 200
    h2 = jax.random.normal(jax.random.PRNGKey(1), (N2, input_dim), jnp.float32)
    out2 = jax.block_until_ready(gnn_mlp_forward(h2, folded_f32, tm=64))
    assert out2.shape == (N2, 32)
    np.testing.assert_allclose(np.asarray(out2),
                               np.asarray(gnn_mlp_reference(h2, params)),
                               rtol=1e-4, atol=1e-4)

    # bf16 HBM streams (default io_dtype): halves the dominant activation
    # traffic; MXU accumulates in f32 and elementwise math stays f32 in-kernel.
    folded_bf16 = prepare_params(params)   # io_dtype=bf16
    out_bf16 = jax.block_until_ready(
        gnn_mlp_forward(h.astype(jnp.bfloat16), folded_bf16, tm=1024))
    assert out_bf16.shape == (N, 32)
    np.testing.assert_allclose(np.asarray(out_bf16, dtype=np.float32), np.asarray(ref),
                               rtol=5e-2, atol=5e-2)

    print("KERNEL_OK")
</pallas_src>

<mosaic_0001>
module attributes {stable_mosaic.version = 11 : i64} {
  func.func @gnn_mlp_kernel(%arg0: i32, %arg1: memref<8x16xf32, #tpu.memory_space<vmem>>, %arg2: memref<16x64xf32, #tpu.memory_space<vmem>>, %arg3: memref<1x64xf32, #tpu.memory_space<vmem>>, %arg4: memref<64x64xf32, #tpu.memory_space<vmem>>, %arg5: memref<1x64xf32, #tpu.memory_space<vmem>>, %arg6: memref<64x32xf32, #tpu.memory_space<vmem>>, %arg7: memref<1x32xf32, #tpu.memory_space<vmem>>, %arg8: memref<8x32xf32, #tpu.memory_space<vmem>>) attributes {dimension_semantics = [#tpu.dimension_semantics<parallel>], iteration_bounds = array<i64: 8>, scalar_prefetch = 0 : i64, scratch_operands = 0 : i64, tpu.core_type = #tpu.core_type<tc>, window_params = [{transform_indices = @transform_0, window_bounds = array<i64: 8, 16>}, {pipeline_mode = #tpu.pipeline_mode<synchronous>, transform_indices = @transform_1, window_bounds = array<i64: 16, 64>}, {pipeline_mode = #tpu.pipeline_mode<synchronous>, transform_indices = @transform_2, window_bounds = array<i64: 1, 64>}, {pipeline_mode = #tpu.pipeline_mode<synchronous>, transform_indices = @transform_3, window_bounds = array<i64: 64, 64>}, {pipeline_mode = #tpu.pipeline_mode<synchronous>, transform_indices = @transform_4, window_bounds = array<i64: 1, 64>}, {pipeline_mode = #tpu.pipeline_mode<synchronous>, transform_indices = @transform_5, window_bounds = array<i64: 64, 32>}, {pipeline_mode = #tpu.pipeline_mode<synchronous>, transform_indices = @transform_6, window_bounds = array<i64: 1, 32>}, {transform_indices = @transform_7, window_bounds = array<i64: 8, 32>}]} {
    %c0 = arith.constant 0 : index
    %c0_0 = arith.constant 0 : index
    %0 = vector.load %arg1[%c0, %c0_0] : memref<8x16xf32, #tpu.memory_space<vmem>>, vector<8x16xf32>
    %c0_1 = arith.constant 0 : index
    %c0_2 = arith.constant 0 : index
    %1 = vector.load %arg2[%c0_1, %c0_2] : memref<16x64xf32, #tpu.memory_space<vmem>>, vector<16x64xf32>
    %cst = arith.constant dense<0.000000e+00> : vector<8x64xf32>
    %2 = tpu.matmul %0, %1, %cst {dimension_numbers = #tpu.dot_dimension_numbers<[1], [0], [0], [1], [0, 0, 1, 1], [], []>} : vector<8x16xf32>, vector<16x64xf32>, vector<8x64xf32> -> vector<8x64xf32>
    %c0_3 = arith.constant 0 : index
    %c0_4 = arith.constant 0 : index
    %3 = vector.load %arg3[%c0_3, %c0_4] : memref<1x64xf32, #tpu.memory_space<vmem>>, vector<1x64xf32>
    %4 = vector.broadcast %3 : vector<1x64xf32> to vector<8x64xf32>
    %5 = arith.addf %2, %4 : vector<8x64xf32>
    %cst_5 = arith.constant 0.000000e+00 : f32
    %6 = vector.broadcast %cst_5 : f32 to vector<8x64xf32>
    %7 = arith.maximumf %5, %6 : vector<8x64xf32>
    %c0_6 = arith.constant 0 : index
    %c0_7 = arith.constant 0 : index
    %8 = vector.load %arg4[%c0_6, %c0_7] : memref<64x64xf32, #tpu.memory_space<vmem>>, vector<64x64xf32>
    %cst_8 = arith.constant dense<0.000000e+00> : vector<8x64xf32>
    %9 = tpu.matmul %7, %8, %cst_8 {dimension_numbers = #tpu.dot_dimension_numbers<[1], [0], [0], [1], [0, 0, 1, 1], [], []>} : vector<8x64xf32>, vector<64x64xf32>, vector<8x64xf32> -> vector<8x64xf32>
    %c0_9 = arith.constant 0 : index
    %c0_10 = arith.constant 0 : index
    %10 = vector.load %arg5[%c0_9, %c0_10] : memref<1x64xf32, #tpu.memory_space<vmem>>, vector<1x64xf32>
    %11 = vector.broadcast %10 : vector<1x64xf32> to vector<8x64xf32>
    %12 = arith.addf %9, %11 : vector<8x64xf32>
    %cst_11 = arith.constant 0.000000e+00 : f32
    %13 = vector.broadcast %cst_11 : f32 to vector<8x64xf32>
    %14 = arith.maximumf %12, %13 : vector<8x64xf32>
    %c0_12 = arith.constant 0 : index
    %c0_13 = arith.constant 0 : index
    %15 = vector.load %arg6[%c0_12, %c0_13] : memref<64x32xf32, #tpu.memory_space<vmem>>, vector<64x32xf32>
    %cst_14 = arith.constant dense<0.000000e+00> : vector<8x32xf32>
    %16 = tpu.matmul %14, %15, %cst_14 {dimension_numbers = #tpu.dot_dimension_numbers<[1], [0], [0], [1], [0, 0, 1, 1], [], []>} : vector<8x64xf32>, vector<64x32xf32>, vector<8x32xf32> -> vector<8x32xf32>
    %c0_15 = arith.constant 0 : index
    %c0_16 = arith.constant 0 : index
    %17 = vector.load %arg7[%c0_15, %c0_16] : memref<1x32xf32, #tpu.memory_space<vmem>>, vector<1x32xf32>
    %18 = vector.broadcast %17 : vector<1x32xf32> to vector<8x32xf32>
    %19 = arith.addf %16, %18 : vector<8x32xf32>
    %cst_17 = arith.constant 0.000000e+00 : f32
    %20 = vector.broadcast %cst_17 : f32 to vector<8x32xf32>
    %21 = arith.maximumf %19, %20 : vector<8x32xf32>
    %c0_18 = arith.constant 0 : index
    %c0_19 = arith.constant 0 : index
    %22 = vector.load %arg8[%c0_18, %c0_19] : memref<8x32xf32, #tpu.memory_space<vmem>>, vector<8x32xf32>
    tpu.vector_store %arg8[%c0_18, %c0_19], %21 {strides = array<i32>} : memref<8x32xf32, #tpu.memory_space<vmem>>, vector<8x32xf32>,
    return
  }
  func.func @transform_0(%arg0: i32) -> (i32, i32) {
    %c0_i32 = arith.constant 0 : i32
    %c0_i32_0 = arith.constant 0 : i32
    return %arg0, %c0_i32 : i32, i32
  }
  func.func @transform_1(%arg0: i32) -> (i32, i32) {
    %c0_i32 = arith.constant 0 : i32
    %c0_i32_0 = arith.constant 0 : i32
    %c0_i32_1 = arith.constant 0 : i32
    return %c0_i32, %c0_i32_0 : i32, i32
  }
  func.func @transform_2(%arg0: i32) -> (i32, i32) {
    %c0_i32 = arith.constant 0 : i32
    %c0_i32_0 = arith.constant 0 : i32
    %c0_i32_1 = arith.constant 0 : i32
    return %c0_i32, %c0_i32_0 : i32, i32
  }
  func.func @transform_3(%arg0: i32) -> (i32, i32) {
    %c0_i32 = arith.constant 0 : i32
    %c0_i32_0 = arith.constant 0 : i32
    %c0_i32_1 = arith.constant 0 : i32
    return %c0_i32, %c0_i32_0 : i32, i32
  }
  func.func @transform_4(%arg0: i32) -> (i32, i32) {
    %c0_i32 = arith.constant 0 : i32
    %c0_i32_0 = arith.constant 0 : i32
    %c0_i32_1 = arith.constant 0 : i32
    return %c0_i32, %c0_i32_0 : i32, i32
  }
  func.func @transform_5(%arg0: i32) -> (i32, i32) {
    %c0_i32 = arith.constant 0 : i32
    %c0_i32_0 = arith.constant 0 : i32
    %c0_i32_1 = arith.constant 0 : i32
    return %c0_i32, %c0_i32_0 : i32, i32
  }
  func.func @transform_6(%arg0: i32) -> (i32, i32) {
    %c0_i32 = arith.constant 0 : i32
    %c0_i32_0 = arith.constant 0 : i32
    %c0_i32_1 = arith.constant 0 : i32
    return %c0_i32, %c0_i32_0 : i32, i32
  }
  func.func @transform_7(%arg0: i32) -> (i32, i32) {
    %c0_i32 = arith.constant 0 : i32
    %c0_i32_0 = arith.constant 0 : i32
    return %arg0, %c0_i32 : i32, i32
  }
}

</mosaic_0001>

<bundles_post_ra>
// kernel: tpu_custom_call.1
= control target key start
LH: loop header
LB: loop body
LE: loop exit
PB: predicated region body
PF: predicated region fallthrough
CT: control target
= control target key end

     0   :  { %s763_s24 = smov 0   ;;  %s853_s0 = inlined_call_operand.vmem [shape: f32[64,16], index: 0, kind: input, shape index: {}]   ;;  %s854_s1 = inlined_call_operand.vmem [shape: f32[16,64], index: 1, kind: input, shape index: {}]   ;;  %s855_s2 = inlined_call_operand.vmem [shape: f32[1,64], index: 2, kind: input, shape index: {}]   ;;  %s856_s3 = inlined_call_operand.vmem [shape: f32[64,64], index: 3, kind: input, shape index: {}]   ;;  %s857_s4 = inlined_call_operand.vmem [shape: f32[1,64], index: 4, kind: input, shape index: {}]   ;;  %s858_s5 = inlined_call_operand.vmem [shape: f32[64,32], index: 5, kind: input, shape index: {}]   ;;  %s859_s6 = inlined_call_operand.vmem [shape: f32[1,32], index: 6, kind: input, shape index: {}]   ;;  %s860_s7 = inlined_call_operand.vmem [shape: f32[64,32], index: 7, kind: output, shape index: {}]  }
   0x1 LB: > { %s593_s25 = sadd.s32 4294967295, %s718_s24   ;;  %p597_p0 = scmp.ge.s32.totalorder %s718_s24, 1  ;;  %s718_s24 = sphi %s763_s24, %s17_s24  }
   0x2   : > { %p236_p1 = scmp.lt.s32.totalorder %s718_s24, 9 }
   0x4   : > { %p237_p2 = pnand %p597_p0, %p236_p1 }
   0x5   : > { %v275_v0 = vld [vmem:[%s854_s1] sm:$0xff] (!%p237_p2)  ;;  %v276_v1 = vld [vmem:[%s854_s1 + $0x8] sm:$0xff] (!%p237_p2)  ;;  %p266_p3 = scmp.lt.s32.totalorder (!%p237_p2), %s593_s25, 7  ;;  %v720_v2 = vmov (!%p237_p2), 0.0|0.0   ;;  %vm721_vm0 = vmmov (!%p237_p2), 0   ;;  %v722_v4 = vmov (!%p237_p2), 0.0  }
   0x6   : > { %240 = sbr.rel (%p237_p2) target bundleno = 666 (0x29a), region = 48  ;;  %674 = vmatprep.subr.bf16.mxu0 (!%p237_p2), %v720_v2  ;;  %v675_v3 = vpack.c.bf16 (!%p237_p2), %v276_v1, %v275_v0  ;;  %633 = vmatprep.mubr.msk.f32.mxu0 (!%p237_p2), %vm721_vm0, %v722_v4  ;;  %v359_v5 = vld [vmem:[%s856_s3] sm:$0xff] (!%p237_p2)  ;;  %v360_v6 = vld [vmem:[%s856_s3 + $0x8] sm:$0xff] (!%p237_p2)  ;;  %v361_v7 = vld [vmem:[%s856_s3 + $0x10] sm:$0xff] (!%p237_p2)  ;;  %vm284_vm1 = vcmask (!%p237_p2), 130048   ;;  %vm374_vm2 = vcmask (!%p237_p2), 523264  }
   0x7   : > { %677 = vmatprep.subr.bf16.mxu1 (!%p237_p2), %v720_v2  ;;  %v678_v8 = vpack.c.bf16 (!%p237_p2), %v360_v6, %v359_v5  ;;  %v362_v9 = vld [vmem:[%s856_s3 + $0x18] sm:$0xff] (!%p237_p2)  ;;  %652 = vmatprep.mubr.msk.f32.mxu1 (!%p237_p2), %vm721_vm0, %v722_v4  ;;  %v363_v11 = vld [vmem:[%s856_s3 + $0x20] sm:$0xff] (!%p237_p2)  ;;  %v364_v12 = vld [vmem:[%s856_s3 + $0x28] sm:$0xff] (!%p237_p2)  ;;  %vm538_vm3 = vcmask (!%p237_p2), 261120  }
   0x8   : > { %676 = vmatpush3.bf16.msra.mxu0 (!%p237_p2), %v675_v3  ;;  %v681_v10 = vpack.c.bf16 (!%p237_p2), %v362_v9, %v361_v7  ;;  %v684_v14 = vpack.c.bf16 (!%p237_p2), %v364_v12, %v363_v11  ;;  %v365_v15 = vld [vmem:[%s856_s3 + $0x30] sm:$0xff] (!%p237_p2)  ;;  %v366_v16 = vld [vmem:[%s856_s3 + $0x38] sm:$0xff] (!%p237_p2)  ;;  %v449_v18 = vld [vmem:[%s858_s5] sm:$0xff] (!%p237_p2) }
   0x9   : > { %679 = vmatpush3.bf16.msra.mxu1 (!%p237_p2), %v678_v8  ;;  %689 = vmatprep.subr.bf16.mxu0 (!%p237_p2), %v720_v2  ;;  %v687_v17 = vpack.c.bf16 (!%p237_p2), %v366_v16, %v365_v15  ;;  %v450_v19 = vld [vmem:[%s858_s5 + $0x8] sm:$0xff] (!%p237_p2)  ;;  %v451_v20 = vld [vmem:[%s858_s5 + $0x10] sm:$0xff] (!%p237_p2)  ;;  %v452_v22 = vld [vmem:[%s858_s5 + $0x18] sm:$0xff] (!%p237_p2) }
   0xa   : > { %680 = vmatprep.subr.bf16.mxu1 (!%p237_p2), %v720_v2  ;;  %v690_v21 = vpack.c.bf16 (!%p237_p2), %v450_v19, %v449_v18  ;;  %v693_v23 = vpack.c.bf16 (!%p237_p2), %v452_v22, %v451_v20  ;;  %v453_v24 = vld [vmem:[%s858_s5 + $0x20] sm:$0xff] (!%p237_p2)  ;;  %v454_v25 = vld [vmem:[%s858_s5 + $0x28] sm:$0xff] (!%p237_p2)  ;;  %v455_v32 = vld [vmem:[%s858_s5 + $0x30] sm:$0xff] (!%p237_p2) }
   0xb   : > { %v696_v26 = vpack.c.bf16 (!%p237_p2), %v454_v25, %v453_v24  ;;  %v600_v27 = vld [vmem:[%s855_s2] ss:$0 sm:$0xff] (!%p237_p2)  ;;  %v456_v33 = vld [vmem:[%s858_s5 + $0x38] sm:$0xff] (!%p237_p2) }
   0xc   : > { %v699_v34 = vpack.c.bf16 (!%p237_p2), %v456_v33, %v455_v32  ;;  %v602_v35 = vld [vmem:[%s857_s4] ss:$0 sm:$0xff] (!%p237_p2) }
   0xd   : > { %s862_s25 = smov (!%p266_p3, %s593_s25), 7  ;;  %682 = vmatpush3.bf16.msra.mxu1 %v681_v10  ;;  %v604_v40 = vld [vmem:[%s859_s6] ss:$0 sm:$0xff] }
   0xe   : > { %s598_s15 = sshll.u32 %s862_s25, 3  ;;  %683 = vmatprep.subr.bf16.mxu1 %v720_v2 }
   0xf   : > { %s269_s18 = scalar_lea.vmem %s853_s0, %s598_s15  ;;  %s273_s10 = scalar_lea.vmem %s860_s7, %s598_s15 }
  0x10   : > { %v274_v13 = vld [vmem:[%s269_s18] sm:$0xff] }
  0x11   : > { %634 = vmatmul.mubr.msk.f32.vlgmr.msra.gmra.mrb[0].mxu0 %vm284_vm1, %v274_v13  ;;  %685 = vmatpush3.bf16.msra.mxu1 %v684_v14 }
  0x12   : > { %671 = vmatprep.mubr.msk.f32.mxu0 %vm721_vm0, %v722_v4  ;;  %686 = vmatprep.subr.bf16.mxu1 %v720_v2 }
  0x13   : > { %691 = vmatpush3.bf16.msra.mxu0 %v690_v21 }
  0x14   : > { %692 = vmatprep.subr.bf16.mxu0 %v720_v2 }
  0x15   : > { %688 = vmatpush3.bf16.msra.mxu1 %v687_v17 }
  0x17   : > { %694 = vmatpush3.bf16.msra.mxu0 %v693_v23 }
  0x18   : > { %695 = vmatprep.subr.bf16.mxu0 %v720_v2 }
  0x1b   : > { %697 = vmatpush3.bf16.msra.mxu0 %v696_v26 }
  0x1c   : > { %698 = vmatprep.subr.bf16.mxu0 %v720_v2 }
  0x1f   : > { %700 = vmatpush3.bf16.msra.mxu0 %v699_v34 }
  0xe4   : > { %v354_v28 = vpop.f32.mrb[0].mxu0 }
  0xe5   : > { %v355_v29 = vadd.f32 %v600_v27, %v354_v28  ;;  %v635_v30 = vpop.f32.mrb[1].mxu0 }
  0xe7   : > { %v358_v31 = vmax.f32 %v355_v29, 0.0 }
  0xe9   : > { %653 = vmatmul.mubr.msk.f32.vlgmr.msra.gmra.mrb[0].mxu1 %vm374_vm2, %v358_v31 }
 0x1bc   : > { %v444_v36 = vpop.f32.mrb[0].mxu1 }
 0x1bd   : > { %v445_v37 = vadd.f32 %v602_v35, %v444_v36  ;;  %v654_v38 = vpop.f32.mrb[1].mxu1 }
 0x1bf   : > { %v448_v39 = vmax.f32 %v445_v37, 0.0 }
 0x1c1   : > { %672 = vmatmul.mubr.msk.f32.vlgmr.msra.gmra.mrb[2].mxu0 %vm374_vm2, %v448_v39 }
 0x294   : > { %v533_v41 = vpop.f32.mrb[2].mxu0 }
 0x295   : > { %v534_v42 = vadd.f32 %v604_v40, %v533_v41  ;;  %v673_v43 = vpop.f32.mrb[3].mxu0 }
 0x297   : > { %v537_v44 = vmax.f32 %v534_v42, 0.0 }
 0x299   : > { %539 = vst.msk [vmem:[%s273_s10] sm:$0xff] %vm538_vm3, %v537_v44 }
 0x29a PF: > { %s17_s24 = sadd.s32 1, %s718_s24  }
 0x29b   : > { %p14_p4 = scmp.ge.s32.totalorder %s17_s24, 10  }
 0x29d   :  { %16 = sbr.rel (!%p14_p4) target bundleno = 1 (0x1), region = 78 }

</bundles_post_ra>
